<compile_context>
chip_gen: v7x
topology: tpu7x:2x2x1
jax: 0.10.0
libtpu: 0.0.40
codegen_flags: <defaults>
</compile_context>

<pallas_src>
import jax
import jax.numpy as jnp
from jax.experimental import pallas as pl
from jax.experimental.pallas import tpu as pltpu

_LANE = 128
_SUBLANE = 8


def _round_up(x, m):
    return ((x + m - 1) // m) * m


# ---------------------------------------------------------------------------
# Kernel: one batch tile per grid step.
# ---------------------------------------------------------------------------
def effdqn_kernel(obs_ref, vs_ref, va_ref, c_ref, wout_ref, bout_ref, out_ref):
    obs = obs_ref[...]                       # (TB, 2) f32
    state = obs[:, 0:1]                      # (TB, 1)
    action = obs[:, 1:2]                     # (TB, 1)

    # Folded front-end: embedders + obs_layer collapse to a rank-2 affine (VPU).
    h = jnp.maximum(state * vs_ref[...] + action * va_ref[...] + c_ref[...], 0.0)

    # Single lane-padded output head on the MXU, bias fused into the store.
    out_ref[...] = (
        jnp.dot(h, wout_ref[...], preferred_element_type=jnp.float32)
        + bout_ref[...]
    )


def effdqn_forward(observation, kparams, *, n_actions, block_b=512):
    """observation: (B, 2) float32.  Returns (B, n_actions) float32."""
    B = observation.shape[0]
    vs, va, c = kparams["vs"], kparams["va"], kparams["c"]
    wout_t, bout = kparams["wout_t"], kparams["bout"]
    Hp = vs.shape[1]
    Ap = wout_t.shape[1]

    # Batch tile: multiple of 8 sublanes, capped at block_b; pad B up to a multiple.
    TB = min(block_b, _round_up(max(B, 1), _SUBLANE))
    Bp = _round_up(B, TB)
    if Bp != B:
        observation = jnp.pad(observation, ((0, Bp - B), (0, 0)))
    grid = (Bp // TB,)

    cost = pl.CostEstimate(
        flops=2 * Bp * Hp * Ap + 6 * Bp * Hp,
        transcendentals=0,
        bytes_accessed=4 * (Bp * 2 + 3 * Hp + Hp * Ap + Ap + Bp * Ap),
    )

    out = pl.pallas_call(
        effdqn_kernel,
        out_shape=jax.ShapeDtypeStruct((Bp, Ap), jnp.float32),
        grid=grid,
        in_specs=[
            pl.BlockSpec((TB, 2), lambda i: (i, 0)),     # obs: streamed per tile
            pl.BlockSpec((1, Hp), lambda i: (0, 0)),     # v_s     : VMEM-resident
            pl.BlockSpec((1, Hp), lambda i: (0, 0)),     # v_a     : VMEM-resident
            pl.BlockSpec((1, Hp), lambda i: (0, 0)),     # c       : VMEM-resident
            pl.BlockSpec((Hp, Ap), lambda i: (0, 0)),    # W_out^T : VMEM-resident
            pl.BlockSpec((1, Ap), lambda i: (0, 0)),     # b_out   : VMEM-resident
        ],
        out_specs=pl.BlockSpec((TB, Ap), lambda i: (i, 0)),
        compiler_params=pltpu.CompilerParams(
            dimension_semantics=("parallel",)),
        cost_estimate=cost,
    )(observation, vs, va, c, wout_t, bout)

    return out[:B, :n_actions]


# ---------------------------------------------------------------------------
# Parameter init (PyTorch nn.Linear default: U(-1/sqrt(fan_in), 1/sqrt(fan_in)))
# ---------------------------------------------------------------------------
def _linear(key, d_in, d_out):
    k1, k2 = jax.random.split(key)
    bound = 1.0 / (d_in ** 0.5)
    w = jax.random.uniform(k1, (d_out, d_in), jnp.float32, -bound, bound)
    b = jax.random.uniform(k2, (d_out,), jnp.float32, -bound, bound)
    return w, b


def init_params(key, *, n_actions, action_size, state_size,
                action_embedding_size, state_embedding_size, n_hidden):
    assert state_size == 1 and action_size == 1, \
        "torch.split(obs, 1, dim=1) into two tensors implies (B, 2) observations"
    k = jax.random.split(key, 4)
    w_s, b_s = _linear(k[0], state_size, state_embedding_size)       # (Se,1),(Se,)
    w_a, b_a = _linear(k[1], action_size, action_embedding_size)     # (Ae,1),(Ae,)
    w_o, b_o = _linear(k[2], state_embedding_size + action_embedding_size, n_hidden)
    w_out, b_out = _linear(k[3], n_hidden, n_actions)
    return dict(w_s=w_s, b_s=b_s, w_a=w_a, b_a=b_a,
                w_o=w_o, b_o=b_o, w_out=w_out, b_out=b_out)


def prepare_kernel_params(params, *, state_embedding_size):
    """Fold embedders + obs_layer into (v_s, v_a, c); lane-pad everything to 128."""
    Se = state_embedding_size
    w_s, b_s = params["w_s"], params["b_s"]
    w_a, b_a = params["w_a"], params["b_a"]
    w_o, b_o = params["w_o"], params["b_o"]
    w_out, b_out = params["w_out"], params["b_out"]

    w_o_s = w_o[:, :Se]          # (n_hidden, Se)
    w_o_a = w_o[:, Se:]          # (n_hidden, Ae)

    vs = w_s.T @ w_o_s.T                                   # (1, n_hidden)
    va = w_a.T @ w_o_a.T                                   # (1, n_hidden)
    c = (b_s @ w_o_s.T + b_a @ w_o_a.T + b_o).reshape(1, -1)

    n_hidden = w_o.shape[0]
    n_actions = w_out.shape[0]
    Hp = _round_up(n_hidden, _LANE)
    Ap = _round_up(n_actions, _LANE)

    def pad2(x, rows, cols):
        return jnp.pad(x, ((0, rows - x.shape[0]), (0, cols - x.shape[1])))

    return {
        "vs": pad2(vs, 1, Hp),
        "va": pad2(va, 1, Hp),
        "c": pad2(c, 1, Hp),
        "wout_t": pad2(w_out.T, Hp, Ap),
        "bout": pad2(b_out.reshape(1, -1), 1, Ap),
    }


# ---------------------------------------------------------------------------
# Pure-JAX reference mirroring the PyTorch forward exactly.
# ---------------------------------------------------------------------------
def reference_forward(observation, params):
    state = observation[:, 0:1]
    action = observation[:, 1:2]
    state_emb = state @ params["w_s"].T + params["b_s"]
    action_emb = action @ params["w_a"].T + params["b_a"]
    obs = jnp.concatenate([state_emb, action_emb], axis=1)
    h = jnp.maximum(obs @ params["w_o"].T + params["b_o"], 0.0)
    return h @ params["w_out"].T + params["b_out"]


if __name__ == "__main__":
    n_actions = 4
    action_size = 1
    state_size = 1
    action_embedding_size = 16
    state_embedding_size = 16
    n_hidden = 32
    batch = 8

    key = jax.random.PRNGKey(0)
    pkey, xkey = jax.random.split(key)

    params = init_params(
        pkey,
        n_actions=n_actions, action_size=action_size, state_size=state_size,
        action_embedding_size=action_embedding_size,
        state_embedding_size=state_embedding_size,
        n_hidden=n_hidden)
    kparams = prepare_kernel_params(params, state_embedding_size=state_embedding_size)

    observation = jax.random.normal(xkey, (batch, 2), jnp.float32)

    y = effdqn_forward(observation, kparams, n_actions=n_actions)
    y = jax.block_until_ready(y)

    y_ref = reference_forward(observation, params)
    assert y.shape == (batch, n_actions)
    assert jnp.allclose(y, y_ref, rtol=1e-4, atol=1e-4), "mismatch vs reference"

    print("KERNEL_OK")
</pallas_src>

<mosaic_0001>
module attributes {stable_mosaic.version = 11 : i64} {
  func.func @effdqn_kernel(%arg0: i32, %arg1: memref<8x2xf32, #tpu.memory_space<vmem>>, %arg2: memref<1x128xf32, #tpu.memory_space<vmem>>, %arg3: memref<1x128xf32, #tpu.memory_space<vmem>>, %arg4: memref<1x128xf32, #tpu.memory_space<vmem>>, %arg5: memref<128x128xf32, #tpu.memory_space<vmem>>, %arg6: memref<1x128xf32, #tpu.memory_space<vmem>>, %arg7: memref<8x128xf32, #tpu.memory_space<vmem>>) attributes {dimension_semantics = [#tpu.dimension_semantics<parallel>], iteration_bounds = array<i64: 1>, scalar_prefetch = 0 : i64, scratch_operands = 0 : i64, tpu.core_type = #tpu.core_type<tc>, window_params = [{transform_indices = @transform_0, window_bounds = array<i64: 8, 2>}, {pipeline_mode = #tpu.pipeline_mode<synchronous>, transform_indices = @transform_1, window_bounds = array<i64: 1, 128>}, {pipeline_mode = #tpu.pipeline_mode<synchronous>, transform_indices = @transform_2, window_bounds = array<i64: 1, 128>}, {pipeline_mode = #tpu.pipeline_mode<synchronous>, transform_indices = @transform_3, window_bounds = array<i64: 1, 128>}, {pipeline_mode = #tpu.pipeline_mode<synchronous>, transform_indices = @transform_4, window_bounds = array<i64: 128, 128>}, {pipeline_mode = #tpu.pipeline_mode<synchronous>, transform_indices = @transform_5, window_bounds = array<i64: 1, 128>}, {transform_indices = @transform_6, window_bounds = array<i64: 8, 128>}]} {
    %c0 = arith.constant 0 : index
    %c0_0 = arith.constant 0 : index
    %0 = vector.load %arg1[%c0, %c0_0] : memref<8x2xf32, #tpu.memory_space<vmem>>, vector<8x2xf32>
    %1 = vector.extract_strided_slice %0 {offsets = [0, 0], sizes = [8, 1], strides = [1, 1]} : vector<8x2xf32> to vector<8x1xf32>
    %2 = vector.extract_strided_slice %0 {offsets = [0, 1], sizes = [8, 1], strides = [1, 1]} : vector<8x2xf32> to vector<8x1xf32>
    %c0_1 = arith.constant 0 : index
    %c0_2 = arith.constant 0 : index
    %3 = vector.load %arg2[%c0_1, %c0_2] : memref<1x128xf32, #tpu.memory_space<vmem>>, vector<1x128xf32>
    %4 = vector.broadcast %1 : vector<8x1xf32> to vector<8x128xf32>
    %5 = vector.broadcast %3 : vector<1x128xf32> to vector<8x128xf32>
    %6 = arith.mulf %4, %5 : vector<8x128xf32>
    %c0_3 = arith.constant 0 : index
    %c0_4 = arith.constant 0 : index
    %7 = vector.load %arg3[%c0_3, %c0_4] : memref<1x128xf32, #tpu.memory_space<vmem>>, vector<1x128xf32>
    %8 = vector.broadcast %2 : vector<8x1xf32> to vector<8x128xf32>
    %9 = vector.broadcast %7 : vector<1x128xf32> to vector<8x128xf32>
    %10 = arith.mulf %8, %9 : vector<8x128xf32>
    %11 = arith.addf %6, %10 : vector<8x128xf32>
    %c0_5 = arith.constant 0 : index
    %c0_6 = arith.constant 0 : index
    %12 = vector.load %arg4[%c0_5, %c0_6] : memref<1x128xf32, #tpu.memory_space<vmem>>, vector<1x128xf32>
    %13 = vector.broadcast %12 : vector<1x128xf32> to vector<8x128xf32>
    %14 = arith.addf %11, %13 : vector<8x128xf32>
    %cst = arith.constant 0.000000e+00 : f32
    %15 = vector.broadcast %cst : f32 to vector<8x128xf32>
    %16 = arith.maximumf %14, %15 : vector<8x128xf32>
    %c0_7 = arith.constant 0 : index
    %c0_8 = arith.constant 0 : index
    %17 = vector.load %arg5[%c0_7, %c0_8] : memref<128x128xf32, #tpu.memory_space<vmem>>, vector<128x128xf32>
    %cst_9 = arith.constant dense<0.000000e+00> : vector<8x128xf32>
    %18 = tpu.matmul %16, %17, %cst_9 {dimension_numbers = #tpu.dot_dimension_numbers<[1], [0], [0], [1], [0, 0, 1, 1], [], []>} : vector<8x128xf32>, vector<128x128xf32>, vector<8x128xf32> -> vector<8x128xf32>
    %c0_10 = arith.constant 0 : index
    %c0_11 = arith.constant 0 : index
    %19 = vector.load %arg6[%c0_10, %c0_11] : memref<1x128xf32, #tpu.memory_space<vmem>>, vector<1x128xf32>
    %20 = vector.broadcast %19 : vector<1x128xf32> to vector<8x128xf32>
    %21 = arith.addf %18, %20 : vector<8x128xf32>
    %c0_12 = arith.constant 0 : index
    %c0_13 = arith.constant 0 : index
    %22 = vector.load %arg7[%c0_12, %c0_13] : memref<8x128xf32, #tpu.memory_space<vmem>>, vector<8x128xf32>
    tpu.vector_store %arg7[%c0_12, %c0_13], %21 {strides = array<i32>} : memref<8x128xf32, #tpu.memory_space<vmem>>, vector<8x128xf32>,
    return
  }
  func.func @transform_0(%arg0: i32) -> (i32, i32) {
    %c0_i32 = arith.constant 0 : i32
    %c0_i32_0 = arith.constant 0 : i32
    return %arg0, %c0_i32 : i32, i32
  }
  func.func @transform_1(%arg0: i32) -> (i32, i32) {
    %c0_i32 = arith.constant 0 : i32
    %c0_i32_0 = arith.constant 0 : i32
    %c0_i32_1 = arith.constant 0 : i32
    return %c0_i32, %c0_i32_0 : i32, i32
  }
  func.func @transform_2(%arg0: i32) -> (i32, i32) {
    %c0_i32 = arith.constant 0 : i32
    %c0_i32_0 = arith.constant 0 : i32
    %c0_i32_1 = arith.constant 0 : i32
    return %c0_i32, %c0_i32_0 : i32, i32
  }
  func.func @transform_3(%arg0: i32) -> (i32, i32) {
    %c0_i32 = arith.constant 0 : i32
    %c0_i32_0 = arith.constant 0 : i32
    %c0_i32_1 = arith.constant 0 : i32
    return %c0_i32, %c0_i32_0 : i32, i32
  }
  func.func @transform_4(%arg0: i32) -> (i32, i32) {
    %c0_i32 = arith.constant 0 : i32
    %c0_i32_0 = arith.constant 0 : i32
    %c0_i32_1 = arith.constant 0 : i32
    return %c0_i32, %c0_i32_0 : i32, i32
  }
  func.func @transform_5(%arg0: i32) -> (i32, i32) {
    %c0_i32 = arith.constant 0 : i32
    %c0_i32_0 = arith.constant 0 : i32
    %c0_i32_1 = arith.constant 0 : i32
    return %c0_i32, %c0_i32_0 : i32, i32
  }
  func.func @transform_6(%arg0: i32) -> (i32, i32) {
    %c0_i32 = arith.constant 0 : i32
    %c0_i32_0 = arith.constant 0 : i32
    return %arg0, %c0_i32 : i32, i32
  }
}

</mosaic_0001>

<bundles_post_ra>
// kernel: tpu_custom_call.1
= control target key start
LH: loop header
LB: loop body
LE: loop exit
PB: predicated region body
PF: predicated region fallthrough
CT: control target
= control target key end

     0   :  { %11 = vsyncpa [#allocation3], 0  ;;  %s405_s0 = inlined_call_operand.vmem [shape: f32[8,2], index: 0, kind: input, shape index: {}]   ;;  %s406_s1 = inlined_call_operand.vmem [shape: f32[1,128], index: 1, kind: input, shape index: {}]   ;;  %s407_s2 = inlined_call_operand.vmem [shape: f32[1,128], index: 2, kind: input, shape index: {}]   ;;  %s408_s3 = inlined_call_operand.vmem [shape: f32[1,128], index: 3, kind: input, shape index: {}]   ;;  %s409_s4 = inlined_call_operand.hbm [shape: f32[128,128], index: 4, kind: input, shape index: {}]   ;;  %s410_s5 = inlined_call_operand.vmem [shape: f32[1,128], index: 5, kind: input, shape index: {}]   ;;  %s411_s6 = inlined_call_operand.hbm [shape: f32[8,128], index: 6, kind: output, shape index: {}]  }
   0x1   :  { %12 = vsyncpa [#allocation4], 0  ;;  %s322_s21 = smov [#allocation2]   ;;  %s274_s25 = scalar_lea.hbm %s409_s4, 2048 }
   0x2   :  { %s26_s22 = sshll.u32 %s322_s21, 4  ;;  %p275_p0 = scmp.ne.s32.totalorder %s409_s4, %s274_s25  ;;  %s27_s22 = int_to_ptr.vmem [resolvable:$true] %s26_s22 }
   0x3   :  { %p278_p1 = scmp.lt.u32.totalorder %s274_s25, %s409_s4 }
   0x5   :  { %p280_p2 = pnand %p278_p1, %p275_p0 }
   0x7   :  { %283 = shalt.err (!%p280_p2)
}
   0x8   :  { %s284_s30 = scalar_lea.vmem %s27_s22, 2048  ;;  %p289_p4 = scmp.lt.s32.totalorder %s27_s22, %s27_s22 }
   0x9   :  { %p285_p3 = scmp.ne.s32.totalorder %s27_s22, %s284_s30  ;;  %p290_p5 = scmp.lt.s32.totalorder %s284_s30, %s284_s30 }
   0xb   :  { %p291_p6 = por %p290_p5, %p289_p4 }
   0xd   :  { %p292_p7 = pnand %p291_p6, %p285_p3 }
   0xf   :  { %295 = shalt.err (!%p292_p7)
}
  0x10   :  { %s323_s7 = smov 128   ;;  %s324_s8 = smov 8  }
  0x11   :  { %32 = dma.hbm_to_vmem [thread:$0]  %s409_s4, 2048, %s27_s22, [#allocation3], %s323_s7, %s323_s7, %s324_s8  }
  0x12   :  { %318 = dma.done.wait [#allocation3], 2048  }
  0x13   :  { %319 = vsyncadd [#allocation3], 4294965248  ;;  %v325_v0 = vmov 0   ;;  %v326_v1 = vmov 0.0|0.0   ;;  %v38_v2 = vld [vmem:[%s405_s0] sm:$0xff]  ;;  %v75_v4 = vld [vmem:[#allocation2 + $0x8] sm:$0xff] }
  0x14   :  { %272 = vset.pattern.permute.xlu0 %v325_v0  ;;  %239 = vmatprep.subr.bf16.mxu0 %v326_v1  ;;  %v74_v3 = vld [vmem:[#allocation2] sm:$0xff]  ;;  %v76_v6 = vld [vmem:[#allocation2 + $0x10] sm:$0xff]  ;;  %v77_v7 = vld [vmem:[#allocation2 + $0x18] sm:$0xff]  ;;  %v327_v11 = vmov 1   ;;  %vm328_vm0 = vmmov 0   ;;  %v329_v15 = vmov 0.0  }
  0x15   :  { %42 = vperm.xlu0 %272, %v38_v2   ;;  %v240_v5 = vpack.c.bf16 %v75_v4, %v74_v3  ;;  %v243_v8 = vpack.c.bf16 %v77_v7, %v76_v6  ;;  %v78_v9 = vld [vmem:[#allocation2 + $0x20] sm:$0xff]  ;;  %v79_v10 = vld [vmem:[#allocation2 + $0x28] sm:$0xff]  ;;  %v80_v13 = vld [vmem:[#allocation2 + $0x30] sm:$0xff]  ;;  %236 = vmatprep.mubr.msk.f32.mxu0 %vm328_vm0, %v329_v15 }
  0x16   :  { %v246_v12 = vpack.c.bf16 %v79_v10, %v78_v9  ;;  %v81_v14 = vld [vmem:[#allocation2 + $0x38] sm:$0xff]  ;;  %v82_v17 = vld [vmem:[#allocation2 + $0x40] sm:$0xff]  ;;  %v83_v18 = vld [vmem:[#allocation2 + $0x48] sm:$0xff] }
  0x17   :  { %241 = vmatpush3.bf16.msra.mxu0 %v240_v5  ;;  %v249_v16 = vpack.c.bf16 %v81_v14, %v80_v13  ;;  %v252_v19 = vpack.c.bf16 %v83_v18, %v82_v17  ;;  %v84_v20 = vld [vmem:[#allocation2 + $0x50] sm:$0xff]  ;;  %v85_v21 = vld [vmem:[#allocation2 + $0x58] sm:$0xff]  ;;  %v86_v23 = vld [vmem:[#allocation2 + $0x60] sm:$0xff] }
  0x18   :  { %242 = vmatprep.subr.bf16.mxu0 %v326_v1  ;;  %v255_v22 = vpack.c.bf16 %v85_v21, %v84_v20  ;;  %v87_v24 = vld [vmem:[#allocation2 + $0x68] sm:$0xff]  ;;  %v88_v26 = vld [vmem:[#allocation2 + $0x70] sm:$0xff]  ;;  %v89_v27 = vld [vmem:[#allocation2 + $0x78] sm:$0xff] }
  0x19   :  { %273 = vset.pattern.permute.xlu0 %v327_v11  ;;  %v258_v25 = vpack.c.bf16 %v87_v24, %v86_v23  ;;  %v261_v28 = vpack.c.bf16 %v89_v27, %v88_v26  ;;  %v183_v30 = vld [vmem:[%s406_s1] ss:$0 sm:$0xff]  ;;  %s330_s1 = smov [#allocation5]  }
  0x1a   :  { %54 = vperm.xlu0 %273, %v38_v2   ;;  %v184_v31 = vld [vmem:[%s407_s2] ss:$0 sm:$0xff]  ;;  %s174_s19 = sshll.u32 %s330_s1, 4  ;;  %s175_s19 = int_to_ptr.vmem [resolvable:$true] %s174_s19 }
  0x1b   :  { %244 = vmatpush3.bf16.msra.mxu0 %v243_v8  ;;  %v185_v35 = vld [vmem:[%s408_s3] ss:$0 sm:$0xff]  ;;  %s296_s2 = scalar_lea.vmem %s175_s19, 128  ;;  %p301_p9 = scmp.lt.s32.totalorder %s175_s19, %s175_s19 }
  0x1c   :  { %245 = vmatprep.subr.bf16.mxu0 %v326_v1  ;;  %v186_v39 = vld [vmem:[%s410_s5] ss:$0 sm:$0xff]  ;;  %p297_p8 = scmp.ne.s32.totalorder %s175_s19, %s296_s2  ;;  %p302_p10 = scmp.lt.s32.totalorder %s296_s2, %s296_s2 }
  0x1e   :  { %p303_p11 = por %p302_p10, %p301_p9 }
  0x1f   :  { %247 = vmatpush3.bf16.msra.mxu0 %v246_v12 }
  0x20   :  { %248 = vmatprep.subr.bf16.mxu0 %v326_v1  ;;  %p304_p12 = pnand %p303_p11, %p297_p8 }
  0x23   :  { %250 = vmatpush3.bf16.msra.mxu0 %v249_v16 }
  0x24   :  { %251 = vmatprep.subr.bf16.mxu0 %v326_v1 }
  0x27   :  { %253 = vmatpush3.bf16.msra.mxu0 %v252_v19 }
  0x28   :  { %254 = vmatprep.subr.bf16.mxu0 %v326_v1 }
  0x2b   :  { %256 = vmatpush3.bf16.msra.mxu0 %v255_v22 }
  0x2c   :  { %257 = vmatprep.subr.bf16.mxu0 %v326_v1 }
  0x2f   :  { %259 = vmatpush3.bf16.msra.mxu0 %v258_v25 }
  0x30   :  { %260 = vmatprep.subr.bf16.mxu0 %v326_v1 }
  0x33   :  { %262 = vmatpush3.bf16.msra.mxu0 %v261_v28 }
  0x94   :  { %v43_v29 = vpop.permute.xlu0 %42 }
  0x95   :  { %v51_v33 = vmul.f32 %v183_v30, %v43_v29 }
  0x99   :  { %v55_v32 = vpop.permute.xlu0 %54 }
  0x9a   :  { %v63_v34 = vmul.f32 %v184_v31, %v55_v32 }
  0x9c   :  { %v64_v36 = vadd.f32 %v63_v34, %v51_v33 }
  0x9e   :  { %v72_v37 = vadd.f32 %v185_v35, %v64_v36 }
  0xa0   :  { %v73_v38 = vmax.f32 %v72_v37, 0.0 }
  0xa2   :  { %237 = vmatmul.mubr.f32.vlgmr.msra.gmra.mrb[0].mxu0 %v73_v38 }
 0x175   :  { %v163_v40 = vpop.f32.mrb[0].mxu0 }
 0x176   :  { %v164_v41 = vadd.f32 %v186_v39, %v163_v40  ;;  %v238_v42 = vpop.f32.mrb[1].mxu0 }
 0x178   :  { %167 = vst [vmem:[#allocation5] sm:$0xff] %v164_v41 }
 0x179   :  { %307 = shalt.err (!%p304_p12)
}
 0x17a   :  { %s308_s21 = scalar_lea.hbm %s411_s6, 128 }
 0x17b   :  { %p309_p13 = scmp.ne.s32.totalorder %s411_s6, %s308_s21  ;;  %p312_p0 = scmp.lt.u32.totalorder %s308_s21, %s411_s6 }
 0x17d   :  { %p314_p1 = pnand %p312_p0, %p309_p13 }
 0x17f   :  { %317 = shalt.err (!%p314_p1)
}
 0x180   :  { %177 = dma.vmem_to_hbm [thread:$0]  %s175_s19, 128, %s411_s6, [#allocation4]  }
 0x181   :  { %320 = dma.done.wait [#allocation4], 128  }
 0x182   :  { %321 = vsyncadd [#allocation4], 4294967168 }
 0x183   :  { %181 = vsyncpa [#allocation3], 1 }
 0x184   :  { %182 = vsyncpa [#allocation4], 1 }

</bundles_post_ra>
